<compile_context>
chip_gen: v7x
topology: tpu7x:2x2x1
jax: 0.10.0
libtpu: 0.0.40
codegen_flags: <defaults>
</compile_context>

<pallas_src>
import functools

import jax
import jax.numpy as jnp
from jax.experimental import pallas as pl
from jax.experimental.pallas import tpu as pltpu


# ----------------------------------------------------------------------------
# Fused kernel: GroupNorm -> l1 -> l2 -> l3, one batch sample per grid step.
# ----------------------------------------------------------------------------
def _fused_forward_kernel(
    x_ref,                        # [1, Cin, TV]
    gn_gamma_ref, gn_beta_ref,    # [Cin, 1]
    m_ref,                        # [3, TV, TV]  adjacency folded with t-1/t/t+1 shift
    wg1_ref, bg1_ref, wt1_ref, wr1_ref, br1_ref,
    wg2_ref, bg2_ref, wt2_ref,
    wg3_ref, bg3_ref, wt3_ref,
    o_ref,                        # [1, Cout, TV]
    *, groups, eps, leaky_slope, mxu_dtype,
):
    def mm(a, b):
        return jnp.dot(a.astype(mxu_dtype), b.astype(mxu_dtype),
                       preferred_element_type=jnp.float32)

    def leaky(v):
        return jnp.where(v >= 0, v, leaky_slope * v)

    x = x_ref[0].astype(jnp.float32)                   # [Cin, TV]
    cin = x.shape[0]
    cg = cin // groups

    # ---- GroupNorm: per-sample, per-group stats over [C/g, T, V] ----------
    # Only tiny [cg, 1] stat vectors are concatenated; the normalization is a
    # single vectorized pass over the full activation.
    mu_parts, rs_parts = [], []
    for g in range(groups):
        xg = x[g * cg:(g + 1) * cg, :]
        mug = jnp.mean(xg)
        varg = jnp.mean((xg - mug) ** 2)
        rsg = jax.lax.rsqrt(varg + eps)
        mu_parts.append(jnp.full((cg, 1), mug, jnp.float32))
        rs_parts.append(jnp.full((cg, 1), rsg, jnp.float32))
    mu_c = jnp.concatenate(mu_parts, axis=0)           # [Cin, 1]
    rs_c = jnp.concatenate(rs_parts, axis=0)           # [Cin, 1]
    x1 = (x - mu_c) * rs_c * gn_gamma_ref[...] + gn_beta_ref[...]

    # Shared shift-folded adjacency operators (identical for all layers).
    m_prev = m_ref[0]                                  # frame t-1 (zero pad)
    m_ctr = m_ref[1]                                   # frame t
    m_next = m_ref[2]                                  # frame t+1 (zero pad)

    def st_gcn_layer(xin, wg_ref, bg_ref, wt_ref):
        # GCNUnit: grouped 1x1 conv == dense matmul vs block-diagonal weight.
        # Dropout(0.5) is identity at inference.
        y = mm(wg_ref[...], xin) + bg_ref[...]         # [Cout, TV]
        # Adjacency einsum + temporal taps, via three [TV, TV] operators.
        u = jnp.concatenate(
            [mm(y, m_prev), mm(y, m_ctr), mm(y, m_next)], axis=0)  # [3*Cout, TV]
        # TemporalUnit: grouped (3,1) conv == one matmul vs [Cout, 3*Cout].
        return mm(wt_ref[...], u)                      # [Cout, TV]

    # ---- l1: residual = Conv1x1 + BatchNorm (BN folded into wr/br offline) --
    z1 = st_gcn_layer(x1, wg1_ref, bg1_ref, wt1_ref)
    r1 = mm(wr1_ref[...], x1) + br1_ref[...]
    f1 = leaky(z1 + r1)

    # ---- l2, l3: residual=False in the module (out = relu(tcn(gcn(x)))) ----
    f2 = leaky(st_gcn_layer(f1, wg2_ref, bg2_ref, wt2_ref))
    f3 = leaky(st_gcn_layer(f2, wg3_ref, bg3_ref, wt3_ref))

    o_ref[0] = f3.astype(o_ref.dtype)


# ----------------------------------------------------------------------------
# Wrapper: offline weight densification / folding + the pallas_call.
# ----------------------------------------------------------------------------
def _grouped_to_dense(w, groups):
    """Grouped 1x1 conv weight [Cout, Cin/groups] -> dense block-diag [Cout, Cin]."""
    cout, cin_g = w.shape
    cout_g = cout // groups
    dense = jnp.zeros((cout, cin_g * groups), w.dtype)
    for g in range(groups):
        dense = dense.at[g * cout_g:(g + 1) * cout_g,
                         g * cin_g:(g + 1) * cin_g].set(
            w[g * cout_g:(g + 1) * cout_g])
    return dense


def _temporal_to_dense(wt, groups):
    """Grouped (3,1) conv weight [Cout, Cout/groups, 3] -> [Cout, 3*Cout]."""
    return jnp.concatenate(
        [_grouped_to_dense(wt[:, :, k], groups) for k in range(3)], axis=1)


def st_stat_gcn_forward(x, params, *, groups, mxu_dtype=jnp.float32,
                        eps=1e-5, bn_eps=1e-5, leaky_slope=0.05):
    B, Cin, T, V = x.shape
    TV = T * V
    c1 = params["l2_wg"].shape[0]

    # ---- fold adjacency with the three temporal-shift operators (exact) ----
    adj = params["adjacency"].astype(jnp.float32)                 # [V, V]
    a_kron = jnp.kron(jnp.eye(T, dtype=jnp.float32), adj)         # [TV, TV]
    p_prev = jnp.eye(TV, k=V, dtype=jnp.float32)                  # picks frame t-1
    p_next = jnp.eye(TV, k=-V, dtype=jnp.float32)                 # picks frame t+1
    m_stack = jnp.stack([a_kron @ p_prev, a_kron, a_kron @ p_next], axis=0)

    # ---- densify grouped conv weights to block-diagonal matrices -----------
    wg1 = _grouped_to_dense(params["l1_wg"], groups)
    wg2 = _grouped_to_dense(params["l2_wg"], groups)
    wg3 = _grouped_to_dense(params["l3_wg"], groups)
    wt1 = _temporal_to_dense(params["l1_wt"], groups)
    wt2 = _temporal_to_dense(params["l2_wt"], groups)
    wt3 = _temporal_to_dense(params["l3_wt"], groups)

    # ---- fold residual BatchNorm (eval mode, running stats) into the conv --
    scale = params["l1_bn_w"] * jax.lax.rsqrt(params["l1_bn_v"] + bn_eps)  # [C0,1]
    wr1 = params["l1_wr"] * scale
    br1 = params["l1_br"] * scale + (params["l1_bn_b"] - params["l1_bn_m"] * scale)

    # ---- lane-dense activations: [B, C, T*V] --------------------------------
    x_flat = x.reshape(B, Cin, TV)

    kernel = functools.partial(
        _fused_forward_kernel, groups=groups, eps=eps,
        leaky_slope=leaky_slope, mxu_dtype=mxu_dtype)

    def _param_spec(a):
        nd = a.ndim
        return pl.BlockSpec(a.shape, (lambda n: (lambda b: (0,) * n))(nd))

    param_list = [
        params["gn_gamma"], params["gn_beta"], m_stack,
        wg1, params["l1_bg"], wt1, wr1, br1,
        wg2, params["l2_bg"], wt2,
        wg3, params["l3_bg"], wt3,
    ]

    out = pl.pallas_call(
        kernel,
        out_shape=jax.ShapeDtypeStruct((B, c1, TV), x.dtype),
        grid=(B,),
        in_specs=[pl.BlockSpec((1, Cin, TV), lambda b: (b, 0, 0))]
                + [_param_spec(a) for a in param_list],
        out_specs=pl.BlockSpec((1, c1, TV), lambda b: (b, 0, 0)),
        compiler_params=pltpu.CompilerParams(
            dimension_semantics=("parallel",),
            vmem_limit_bytes=32 * 1024 * 1024),
    )(x_flat, *param_list)

    return out.reshape(B, c1, T, V)


# ----------------------------------------------------------------------------
# Parameter construction (stand-ins for the PyTorch module's initialization).
# ----------------------------------------------------------------------------
def _chain_adjacency(V):
    # deterministic stand-in for Graph(max_hop=1): chain + self-loops, row-normalized
    a = jnp.eye(V, dtype=jnp.float32)
    idx = jnp.arange(V - 1)
    a = a.at[idx, idx + 1].set(1.0)
    a = a.at[idx + 1, idx].set(1.0)
    deg = jnp.sum(a, axis=1, keepdims=True)
    return a / deg


def init_params(key, in_channels, channels, groups, V):
    c0, c1 = channels
    ks = jax.random.split(key, 10)

    def w(k, shape, scale=0.1):
        return scale * jax.random.normal(k, shape, jnp.float32)

    return {
        "adjacency": _chain_adjacency(V),
        # GroupNorm affine (PyTorch defaults: gamma=1, beta=0)
        "gn_gamma": jnp.ones((in_channels, 1), jnp.float32),
        "gn_beta": jnp.zeros((in_channels, 1), jnp.float32),
        # l1: GCN conv (grouped 1x1), TCN conv (grouped 3x1), residual conv + BN
        "l1_wg": w(ks[0], (c0, in_channels // groups)),
        "l1_bg": w(ks[1], (c0, 1), 0.01),
        "l1_wt": w(ks[2], (c0, c0 // groups, 3)),
        "l1_wr": w(ks[3], (c0, in_channels)),
        "l1_br": w(ks[4], (c0, 1), 0.01),
        "l1_bn_w": jnp.ones((c0, 1), jnp.float32),
        "l1_bn_b": jnp.zeros((c0, 1), jnp.float32),
        "l1_bn_m": jnp.zeros((c0, 1), jnp.float32),
        "l1_bn_v": jnp.ones((c0, 1), jnp.float32),
        # l2
        "l2_wg": w(ks[5], (c1, c0 // groups)),
        "l2_bg": w(ks[6], (c1, 1), 0.01),
        "l2_wt": w(ks[7], (c1, c1 // groups, 3)),
        # l3
        "l3_wg": w(ks[8], (c1, c1 // groups)),
        "l3_bg": w(ks[9], (c1, 1), 0.01),
        "l3_wt": w(jax.random.fold_in(key, 99), (c1, c1 // groups, 3)),
    }


if __name__ == "__main__":
    B, Cin, T, V = 2, 4, 8, 16
    groups = 2
    channels = [8, 16]

    key = jax.random.PRNGKey(0)
    kx, kp = jax.random.split(key)
    x = jax.random.normal(kx, (B, Cin, T, V), jnp.float32)
    params = init_params(kp, Cin, channels, groups, V)

    out = st_stat_gcn_forward(x, params, groups=groups)
    jax.block_until_ready(out)
    assert out.shape == (B, channels[-1], T, V)
    print("KERNEL_OK")
</pallas_src>

<mosaic_0001>
module attributes {stable_mosaic.version = 11 : i64} {
  func.func @_fused_forward_kernel(%arg0: i32, %arg1: memref<1x4x128xf32, #tpu.memory_space<vmem>>, %arg2: memref<4x1xf32, #tpu.memory_space<vmem>>, %arg3: memref<4x1xf32, #tpu.memory_space<vmem>>, %arg4: memref<3x128x128xf32, #tpu.memory_space<vmem>>, %arg5: memref<8x4xf32, #tpu.memory_space<vmem>>, %arg6: memref<8x1xf32, #tpu.memory_space<vmem>>, %arg7: memref<8x24xf32, #tpu.memory_space<vmem>>, %arg8: memref<8x4xf32, #tpu.memory_space<vmem>>, %arg9: memref<8x1xf32, #tpu.memory_space<vmem>>, %arg10: memref<16x8xf32, #tpu.memory_space<vmem>>, %arg11: memref<16x1xf32, #tpu.memory_space<vmem>>, %arg12: memref<16x48xf32, #tpu.memory_space<vmem>>, %arg13: memref<16x16xf32, #tpu.memory_space<vmem>>, %arg14: memref<16x1xf32, #tpu.memory_space<vmem>>, %arg15: memref<16x48xf32, #tpu.memory_space<vmem>>, %arg16: memref<1x16x128xf32, #tpu.memory_space<vmem>>) attributes {dimension_semantics = [#tpu.dimension_semantics<parallel>], iteration_bounds = array<i64: 2>, scalar_prefetch = 0 : i64, scratch_operands = 0 : i64, tpu.core_type = #tpu.core_type<tc>, window_params = [{transform_indices = @transform_0, window_bounds = array<i64: 1, 4, 128>}, {pipeline_mode = #tpu.pipeline_mode<synchronous>, transform_indices = @transform_1, window_bounds = array<i64: 4, 1>}, {pipeline_mode = #tpu.pipeline_mode<synchronous>, transform_indices = @transform_2, window_bounds = array<i64: 4, 1>}, {pipeline_mode = #tpu.pipeline_mode<synchronous>, transform_indices = @transform_3, window_bounds = array<i64: 3, 128, 128>}, {pipeline_mode = #tpu.pipeline_mode<synchronous>, transform_indices = @transform_4, window_bounds = array<i64: 8, 4>}, {pipeline_mode = #tpu.pipeline_mode<synchronous>, transform_indices = @transform_5, window_bounds = array<i64: 8, 1>}, {pipeline_mode = #tpu.pipeline_mode<synchronous>, transform_indices = @transform_6, window_bounds = array<i64: 8, 24>}, {pipeline_mode = #tpu.pipeline_mode<synchronous>, transform_indices = @transform_7, window_bounds = array<i64: 8, 4>}, {pipeline_mode = #tpu.pipeline_mode<synchronous>, transform_indices = @transform_8, window_bounds = array<i64: 8, 1>}, {pipeline_mode = #tpu.pipeline_mode<synchronous>, transform_indices = @transform_9, window_bounds = array<i64: 16, 8>}, {pipeline_mode = #tpu.pipeline_mode<synchronous>, transform_indices = @transform_10, window_bounds = array<i64: 16, 1>}, {pipeline_mode = #tpu.pipeline_mode<synchronous>, transform_indices = @transform_11, window_bounds = array<i64: 16, 48>}, {pipeline_mode = #tpu.pipeline_mode<synchronous>, transform_indices = @transform_12, window_bounds = array<i64: 16, 16>}, {pipeline_mode = #tpu.pipeline_mode<synchronous>, transform_indices = @transform_13, window_bounds = array<i64: 16, 1>}, {pipeline_mode = #tpu.pipeline_mode<synchronous>, transform_indices = @transform_14, window_bounds = array<i64: 16, 48>}, {transform_indices = @transform_15, window_bounds = array<i64: 1, 16, 128>}]} {
    %c0 = arith.constant 0 : index
    %c0_0 = arith.constant 0 : index
    %c0_1 = arith.constant 0 : index
    %0 = vector.load %arg1[%c0, %c0_0, %c0_1] : memref<1x4x128xf32, #tpu.memory_space<vmem>>, vector<1x4x128xf32>
    %1 = vector.shape_cast %0 : vector<1x4x128xf32> to vector<4x128xf32>
    %2 = vector.extract_strided_slice %1 {offsets = [0, 0], sizes = [2, 128], strides = [1, 1]} : vector<4x128xf32> to vector<2x128xf32>
    %3 = vector.shape_cast %2 : vector<2x128xf32> to vector<1x2x128xf32>
    %cst = arith.constant dense<0.000000e+00> : vector<1xf32>
    %4 = vector.multi_reduction <add>, %3, %cst [1, 2] : vector<1x2x128xf32> to vector<1xf32>
    %5 = vector.shape_cast %4 : vector<1xf32> to vector<1x1x1xf32>
    %6 = vector.extract %5[0, 0, 0] : f32 from vector<1x1x1xf32>
    %cst_2 = arith.constant 2.560000e+02 : f32
    %7 = arith.divf %6, %cst_2 : f32
    %8 = vector.broadcast %7 : f32 to vector<2x128xf32>
    %9 = arith.subf %2, %8 : vector<2x128xf32>
    %10 = arith.mulf %9, %9 : vector<2x128xf32>
    %11 = vector.shape_cast %10 : vector<2x128xf32> to vector<1x2x128xf32>
    %cst_3 = arith.constant dense<0.000000e+00> : vector<1xf32>
    %12 = vector.multi_reduction <add>, %11, %cst_3 [1, 2] : vector<1x2x128xf32> to vector<1xf32>
    %13 = vector.shape_cast %12 : vector<1xf32> to vector<1x1x1xf32>
    %14 = vector.extract %13[0, 0, 0] : f32 from vector<1x1x1xf32>
    %cst_4 = arith.constant 2.560000e+02 : f32
    %15 = arith.divf %14, %cst_4 : f32
    %cst_5 = arith.constant 9.99999974E-6 : f32
    %16 = arith.addf %15, %cst_5 : f32
    %17 = math.rsqrt %16 : f32
    %18 = vector.broadcast %7 : f32 to vector<2x1xf32>
    %19 = vector.broadcast %17 : f32 to vector<2x1xf32>
    %20 = vector.extract_strided_slice %1 {offsets = [2, 0], sizes = [2, 128], strides = [1, 1]} : vector<4x128xf32> to vector<2x128xf32>
    %21 = vector.shape_cast %20 : vector<2x128xf32> to vector<1x2x128xf32>
    %cst_6 = arith.constant dense<0.000000e+00> : vector<1xf32>
    %22 = vector.multi_reduction <add>, %21, %cst_6 [1, 2] : vector<1x2x128xf32> to vector<1xf32>
    %23 = vector.shape_cast %22 : vector<1xf32> to vector<1x1x1xf32>
    %24 = vector.extract %23[0, 0, 0] : f32 from vector<1x1x1xf32>
    %cst_7 = arith.constant 2.560000e+02 : f32
    %25 = arith.divf %24, %cst_7 : f32
    %26 = vector.broadcast %25 : f32 to vector<2x128xf32>
    %27 = arith.subf %20, %26 : vector<2x128xf32>
    %28 = arith.mulf %27, %27 : vector<2x128xf32>
    %29 = vector.shape_cast %28 : vector<2x128xf32> to vector<1x2x128xf32>
    %cst_8 = arith.constant dense<0.000000e+00> : vector<1xf32>
    %30 = vector.multi_reduction <add>, %29, %cst_8 [1, 2] : vector<1x2x128xf32> to vector<1xf32>
    %31 = vector.shape_cast %30 : vector<1xf32> to vector<1x1x1xf32>
    %32 = vector.extract %31[0, 0, 0] : f32 from vector<1x1x1xf32>
    %cst_9 = arith.constant 2.560000e+02 : f32
    %33 = arith.divf %32, %cst_9 : f32
    %cst_10 = arith.constant 9.99999974E-6 : f32
    %34 = arith.addf %33, %cst_10 : f32
    %35 = math.rsqrt %34 : f32
    %36 = vector.broadcast %25 : f32 to vector<2x1xf32>
    %37 = vector.broadcast %35 : f32 to vector<2x1xf32>
    %38 = tpu.concatenate %18, %36 in 0 : vector<2x1xf32>, vector<2x1xf32> -> vector<4x1xf32>
    %39 = tpu.concatenate %19, %37 in 0 : vector<2x1xf32>, vector<2x1xf32> -> vector<4x1xf32>
    %40 = vector.broadcast %38 : vector<4x1xf32> to vector<4x128xf32>
    %41 = arith.subf %1, %40 : vector<4x128xf32>
    %42 = vector.broadcast %39 : vector<4x1xf32> to vector<4x128xf32>
    %43 = arith.mulf %41, %42 : vector<4x128xf32>
    %c0_11 = arith.constant 0 : index
    %c0_12 = arith.constant 0 : index
    %44 = vector.load %arg2[%c0_11, %c0_12] : memref<4x1xf32, #tpu.memory_space<vmem>>, vector<4x1xf32>
    %45 = vector.broadcast %44 : vector<4x1xf32> to vector<4x128xf32>
    %46 = arith.mulf %43, %45 : vector<4x128xf32>
    %c0_13 = arith.constant 0 : index
    %c0_14 = arith.constant 0 : index
    %47 = vector.load %arg3[%c0_13, %c0_14] : memref<4x1xf32, #tpu.memory_space<vmem>>, vector<4x1xf32>
    %48 = vector.broadcast %47 : vector<4x1xf32> to vector<4x128xf32>
    %49 = arith.addf %46, %48 : vector<4x128xf32>
    %c0_15 = arith.constant 0 : index
    %c0_16 = arith.constant 0 : index
    %c0_17 = arith.constant 0 : index
    %50 = vector.load %arg4[%c0_15, %c0_16, %c0_17] : memref<3x128x128xf32, #tpu.memory_space<vmem>>, vector<1x128x128xf32>
    %51 = vector.shape_cast %50 : vector<1x128x128xf32> to vector<128x128xf32>
    %c1 = arith.constant 1 : index
    %c0_18 = arith.constant 0 : index
    %c0_19 = arith.constant 0 : index
    %52 = vector.load %arg4[%c1, %c0_18, %c0_19] : memref<3x128x128xf32, #tpu.memory_space<vmem>>, vector<1x128x128xf32>
    %53 = vector.shape_cast %52 : vector<1x128x128xf32> to vector<128x128xf32>
    %c2 = arith.constant 2 : index
    %c0_20 = arith.constant 0 : index
    %c0_21 = arith.constant 0 : index
    %54 = vector.load %arg4[%c2, %c0_20, %c0_21] : memref<3x128x128xf32, #tpu.memory_space<vmem>>, vector<1x128x128xf32>
    %55 = vector.shape_cast %54 : vector<1x128x128xf32> to vector<128x128xf32>
    %c0_22 = arith.constant 0 : index
    %c0_23 = arith.constant 0 : index
    %56 = vector.load %arg5[%c0_22, %c0_23] : memref<8x4xf32, #tpu.memory_space<vmem>>, vector<8x4xf32>
    %cst_24 = arith.constant dense<0.000000e+00> : vector<8x128xf32>
    %57 = tpu.matmul %56, %49, %cst_24 {dimension_numbers = #tpu.dot_dimension_numbers<[1], [0], [0], [1], [0, 0, 1, 1], [], []>} : vector<8x4xf32>, vector<4x128xf32>, vector<8x128xf32> -> vector<8x128xf32>
    %c0_25 = arith.constant 0 : index
    %c0_26 = arith.constant 0 : index
    %58 = vector.load %arg6[%c0_25, %c0_26] : memref<8x1xf32, #tpu.memory_space<vmem>>, vector<8x1xf32>
    %59 = vector.broadcast %58 : vector<8x1xf32> to vector<8x128xf32>
    %60 = arith.addf %57, %59 : vector<8x128xf32>
    %cst_27 = arith.constant dense<0.000000e+00> : vector<8x128xf32>
    %61 = tpu.matmul %60, %51, %cst_27 {dimension_numbers = #tpu.dot_dimension_numbers<[1], [0], [0], [1], [0, 0, 1, 1], [], []>} : vector<8x128xf32>, vector<128x128xf32>, vector<8x128xf32> -> vector<8x128xf32>
    %cst_28 = arith.constant dense<0.000000e+00> : vector<8x128xf32>
    %62 = tpu.matmul %60, %53, %cst_28 {dimension_numbers = #tpu.dot_dimension_numbers<[1], [0], [0], [1], [0, 0, 1, 1], [], []>} : vector<8x128xf32>, vector<128x128xf32>, vector<8x128xf32> -> vector<8x128xf32>
    %cst_29 = arith.constant dense<0.000000e+00> : vector<8x128xf32>
    %63 = tpu.matmul %60, %55, %cst_29 {dimension_numbers = #tpu.dot_dimension_numbers<[1], [0], [0], [1], [0, 0, 1, 1], [], []>} : vector<8x128xf32>, vector<128x128xf32>, vector<8x128xf32> -> vector<8x128xf32>
    %64 = tpu.concatenate %61, %62, %63 in 0 : vector<8x128xf32>, vector<8x128xf32>, vector<8x128xf32> -> vector<24x128xf32>
    %c0_30 = arith.constant 0 : index
    %c0_31 = arith.constant 0 : index
    %65 = vector.load %arg7[%c0_30, %c0_31] : memref<8x24xf32, #tpu.memory_space<vmem>>, vector<8x24xf32>
    %cst_32 = arith.constant dense<0.000000e+00> : vector<8x128xf32>
    %66 = tpu.matmul %65, %64, %cst_32 {dimension_numbers = #tpu.dot_dimension_numbers<[1], [0], [0], [1], [0, 0, 1, 1], [], []>} : vector<8x24xf32>, vector<24x128xf32>, vector<8x128xf32> -> vector<8x128xf32>
    %c0_33 = arith.constant 0 : index
    %c0_34 = arith.constant 0 : index
    %67 = vector.load %arg8[%c0_33, %c0_34] : memref<8x4xf32, #tpu.memory_space<vmem>>, vector<8x4xf32>
    %cst_35 = arith.constant dense<0.000000e+00> : vector<8x128xf32>
    %68 = tpu.matmul %67, %49, %cst_35 {dimension_numbers = #tpu.dot_dimension_numbers<[1], [0], [0], [1], [0, 0, 1, 1], [], []>} : vector<8x4xf32>, vector<4x128xf32>, vector<8x128xf32> -> vector<8x128xf32>
    %c0_36 = arith.constant 0 : index
    %c0_37 = arith.constant 0 : index
    %69 = vector.load %arg9[%c0_36, %c0_37] : memref<8x1xf32, #tpu.memory_space<vmem>>, vector<8x1xf32>
    %70 = vector.broadcast %69 : vector<8x1xf32> to vector<8x128xf32>
    %71 = arith.addf %68, %70 : vector<8x128xf32>
    %72 = arith.addf %66, %71 : vector<8x128xf32>
    %cst_38 = arith.constant 0.000000e+00 : f32
    %73 = vector.broadcast %cst_38 : f32 to vector<8x128xf32>
    %74 = arith.cmpf oge, %72, %73 : vector<8x128xf32>
    %cst_39 = arith.constant 5.000000e-02 : f32
    %75 = vector.broadcast %cst_39 : f32 to vector<8x128xf32>
    %76 = arith.mulf %75, %72 : vector<8x128xf32>
    %77 = arith.select %74, %72, %76 : vector<8x128xi1>, vector<8x128xf32>
    %c0_40 = arith.constant 0 : index
    %c0_41 = arith.constant 0 : index
    %78 = vector.load %arg10[%c0_40, %c0_41] : memref<16x8xf32, #tpu.memory_space<vmem>>, vector<16x8xf32>
    %cst_42 = arith.constant dense<0.000000e+00> : vector<16x128xf32>
    %79 = tpu.matmul %78, %77, %cst_42 {dimension_numbers = #tpu.dot_dimension_numbers<[1], [0], [0], [1], [0, 0, 1, 1], [], []>} : vector<16x8xf32>, vector<8x128xf32>, vector<16x128xf32> -> vector<16x128xf32>
    %c0_43 = arith.constant 0 : index
    %c0_44 = arith.constant 0 : index
    %80 = vector.load %arg11[%c0_43, %c0_44] : memref<16x1xf32, #tpu.memory_space<vmem>>, vector<16x1xf32>
    %81 = vector.broadcast %80 : vector<16x1xf32> to vector<16x128xf32>
    %82 = arith.addf %79, %81 : vector<16x128xf32>
    %cst_45 = arith.constant dense<0.000000e+00> : vector<16x128xf32>
    %83 = tpu.matmul %82, %51, %cst_45 {dimension_numbers = #tpu.dot_dimension_numbers<[1], [0], [0], [1], [0, 0, 1, 1], [], []>} : vector<16x128xf32>, vector<128x128xf32>, vector<16x128xf32> -> vector<16x128xf32>
    %cst_46 = arith.constant dense<0.000000e+00> : vector<16x128xf32>
    %84 = tpu.matmul %82, %53, %cst_46 {dimension_numbers = #tpu.dot_dimension_numbers<[1], [0], [0], [1], [0, 0, 1, 1], [], []>} : vector<16x128xf32>, vector<128x128xf32>, vector<16x128xf32> -> vector<16x128xf32>
    %cst_47 = arith.constant dense<0.000000e+00> : vector<16x128xf32>
    %85 = tpu.matmul %82, %55, %cst_47 {dimension_numbers = #tpu.dot_dimension_numbers<[1], [0], [0], [1], [0, 0, 1, 1], [], []>} : vector<16x128xf32>, vector<128x128xf32>, vector<16x128xf32> -> vector<16x128xf32>
    %86 = tpu.concatenate %83, %84, %85 in 0 : vector<16x128xf32>, vector<16x128xf32>, vector<16x128xf32> -> vector<48x128xf32>
    %c0_48 = arith.constant 0 : index
    %c0_49 = arith.constant 0 : index
    %87 = vector.load %arg12[%c0_48, %c0_49] : memref<16x48xf32, #tpu.memory_space<vmem>>, vector<16x48xf32>
    %cst_50 = arith.constant dense<0.000000e+00> : vector<16x128xf32>
    %88 = tpu.matmul %87, %86, %cst_50 {dimension_numbers = #tpu.dot_dimension_numbers<[1], [0], [0], [1], [0, 0, 1, 1], [], []>} : vector<16x48xf32>, vector<48x128xf32>, vector<16x128xf32> -> vector<16x128xf32>
    %cst_51 = arith.constant 0.000000e+00 : f32
    %89 = vector.broadcast %cst_51 : f32 to vector<16x128xf32>
    %90 = arith.cmpf oge, %88, %89 : vector<16x128xf32>
    %cst_52 = arith.constant 5.000000e-02 : f32
    %91 = vector.broadcast %cst_52 : f32 to vector<16x128xf32>
    %92 = arith.mulf %91, %88 : vector<16x128xf32>
    %93 = arith.select %90, %88, %92 : vector<16x128xi1>, vector<16x128xf32>
    %c0_53 = arith.constant 0 : index
    %c0_54 = arith.constant 0 : index
    %94 = vector.load %arg13[%c0_53, %c0_54] : memref<16x16xf32, #tpu.memory_space<vmem>>, vector<16x16xf32>
    %cst_55 = arith.constant dense<0.000000e+00> : vector<16x128xf32>
    %95 = tpu.matmul %94, %93, %cst_55 {dimension_numbers = #tpu.dot_dimension_numbers<[1], [0], [0], [1], [0, 0, 1, 1], [], []>} : vector<16x16xf32>, vector<16x128xf32>, vector<16x128xf32> -> vector<16x128xf32>
    %c0_56 = arith.constant 0 : index
    %c0_57 = arith.constant 0 : index
    %96 = vector.load %arg14[%c0_56, %c0_57] : memref<16x1xf32, #tpu.memory_space<vmem>>, vector<16x1xf32>
    %97 = vector.broadcast %96 : vector<16x1xf32> to vector<16x128xf32>
    %98 = arith.addf %95, %97 : vector<16x128xf32>
    %cst_58 = arith.constant dense<0.000000e+00> : vector<16x128xf32>
    %99 = tpu.matmul %98, %51, %cst_58 {dimension_numbers = #tpu.dot_dimension_numbers<[1], [0], [0], [1], [0, 0, 1, 1], [], []>} : vector<16x128xf32>, vector<128x128xf32>, vector<16x128xf32> -> vector<16x128xf32>
    %cst_59 = arith.constant dense<0.000000e+00> : vector<16x128xf32>
    %100 = tpu.matmul %98, %53, %cst_59 {dimension_numbers = #tpu.dot_dimension_numbers<[1], [0], [0], [1], [0, 0, 1, 1], [], []>} : vector<16x128xf32>, vector<128x128xf32>, vector<16x128xf32> -> vector<16x128xf32>
    %cst_60 = arith.constant dense<0.000000e+00> : vector<16x128xf32>
    %101 = tpu.matmul %98, %55, %cst_60 {dimension_numbers = #tpu.dot_dimension_numbers<[1], [0], [0], [1], [0, 0, 1, 1], [], []>} : vector<16x128xf32>, vector<128x128xf32>, vector<16x128xf32> -> vector<16x128xf32>
    %102 = tpu.concatenate %99, %100, %101 in 0 : vector<16x128xf32>, vector<16x128xf32>, vector<16x128xf32> -> vector<48x128xf32>
    %c0_61 = arith.constant 0 : index
    %c0_62 = arith.constant 0 : index
    %103 = vector.load %arg15[%c0_61, %c0_62] : memref<16x48xf32, #tpu.memory_space<vmem>>, vector<16x48xf32>
    %cst_63 = arith.constant dense<0.000000e+00> : vector<16x128xf32>
    %104 = tpu.matmul %103, %102, %cst_63 {dimension_numbers = #tpu.dot_dimension_numbers<[1], [0], [0], [1], [0, 0, 1, 1], [], []>} : vector<16x48xf32>, vector<48x128xf32>, vector<16x128xf32> -> vector<16x128xf32>
    %cst_64 = arith.constant 0.000000e+00 : f32
    %105 = vector.broadcast %cst_64 : f32 to vector<16x128xf32>
    %106 = arith.cmpf oge, %104, %105 : vector<16x128xf32>
    %cst_65 = arith.constant 5.000000e-02 : f32
    %107 = vector.broadcast %cst_65 : f32 to vector<16x128xf32>
    %108 = arith.mulf %107, %104 : vector<16x128xf32>
    %109 = arith.select %106, %104, %108 : vector<16x128xi1>, vector<16x128xf32>
    %c0_66 = arith.constant 0 : index
    %c0_67 = arith.constant 0 : index
    %c0_68 = arith.constant 0 : index
    %110 = vector.load %arg16[%c0_66, %c0_67, %c0_68] : memref<1x16x128xf32, #tpu.memory_space<vmem>>, vector<1x16x128xf32>
    %111 = vector.shape_cast %110 : vector<1x16x128xf32> to vector<16x128xf32>
    %112 = vector.shape_cast %109 : vector<16x128xf32> to vector<1x16x128xf32>
    tpu.vector_store %arg16[%c0_66, %c0_67, %c0_68], %112 {strides = array<i32>} : memref<1x16x128xf32, #tpu.memory_space<vmem>>, vector<1x16x128xf32>,
    return
  }
  func.func @transform_0(%arg0: i32) -> (i32, i32, i32) {
    %c0_i32 = arith.constant 0 : i32
    %c0_i32_0 = arith.constant 0 : i32
    %c0_i32_1 = arith.constant 0 : i32
    return %arg0, %c0_i32, %c0_i32_0 : i32, i32, i32
  }
  func.func @transform_1(%arg0: i32) -> (i32, i32) {
    %c0_i32 = arith.constant 0 : i32
    %c0_i32_0 = arith.constant 0 : i32
    %c0_i32_1 = arith.constant 0 : i32
    return %c0_i32, %c0_i32_0 : i32, i32
  }
  func.func @transform_2(%arg0: i32) -> (i32, i32) {
    %c0_i32 = arith.constant 0 : i32
    %c0_i32_0 = arith.constant 0 : i32
    %c0_i32_1 = arith.constant 0 : i32
    return %c0_i32, %c0_i32_0 : i32, i32
  }
  func.func @transform_3(%arg0: i32) -> (i32, i32, i32) {
    %c0_i32 = arith.constant 0 : i32
    %c0_i32_0 = arith.constant 0 : i32
    %c0_i32_1 = arith.constant 0 : i32
    %c0_i32_2 = arith.constant 0 : i32
    return %c0_i32, %c0_i32_0, %c0_i32_1 : i32, i32, i32
  }
  func.func @transform_4(%arg0: i32) -> (i32, i32) {
    %c0_i32 = arith.constant 0 : i32
    %c0_i32_0 = arith.constant 0 : i32
    %c0_i32_1 = arith.constant 0 : i32
    return %c0_i32, %c0_i32_0 : i32, i32
  }
  func.func @transform_5(%arg0: i32) -> (i32, i32) {
    %c0_i32 = arith.constant 0 : i32
    %c0_i32_0 = arith.constant 0 : i32
    %c0_i32_1 = arith.constant 0 : i32
    return %c0_i32, %c0_i32_0 : i32, i32
  }
  func.func @transform_6(%arg0: i32) -> (i32, i32) {
    %c0_i32 = arith.constant 0 : i32
    %c0_i32_0 = arith.constant 0 : i32
    %c0_i32_1 = arith.constant 0 : i32
    return %c0_i32, %c0_i32_0 : i32, i32
  }
  func.func @transform_7(%arg0: i32) -> (i32, i32) {
    %c0_i32 = arith.constant 0 : i32
    %c0_i32_0 = arith.constant 0 : i32
    %c0_i32_1 = arith.constant 0 : i32
    return %c0_i32, %c0_i32_0 : i32, i32
  }
  func.func @transform_8(%arg0: i32) -> (i32, i32) {
    %c0_i32 = arith.constant 0 : i32
    %c0_i32_0 = arith.constant 0 : i32
    %c0_i32_1 = arith.constant 0 : i32
    return %c0_i32, %c0_i32_0 : i32, i32
  }
  func.func @transform_9(%arg0: i32) -> (i32, i32) {
    %c0_i32 = arith.constant 0 : i32
    %c0_i32_0 = arith.constant 0 : i32
    %c0_i32_1 = arith.constant 0 : i32
    return %c0_i32, %c0_i32_0 : i32, i32
  }
  func.func @transform_10(%arg0: i32) -> (i32, i32) {
    %c0_i32 = arith.constant 0 : i32
    %c0_i32_0 = arith.constant 0 : i32
    %c0_i32_1 = arith.constant 0 : i32
    return %c0_i32, %c0_i32_0 : i32, i32
  }
  func.func @transform_11(%arg0: i32) -> (i32, i32) {
    %c0_i32 = arith.constant 0 : i32
    %c0_i32_0 = arith.constant 0 : i32
    %c0_i32_1 = arith.constant 0 : i32
    return %c0_i32, %c0_i32_0 : i32, i32
  }
  func.func @transform_12(%arg0: i32) -> (i32, i32) {
    %c0_i32 = arith.constant 0 : i32
    %c0_i32_0 = arith.constant 0 : i32
    %c0_i32_1 = arith.constant 0 : i32
    return %c0_i32, %c0_i32_0 : i32, i32
  }
  func.func @transform_13(%arg0: i32) -> (i32, i32) {
    %c0_i32 = arith.constant 0 : i32
    %c0_i32_0 = arith.constant 0 : i32
    %c0_i32_1 = arith.constant 0 : i32
    return %c0_i32, %c0_i32_0 : i32, i32
  }
  func.func @transform_14(%arg0: i32) -> (i32, i32) {
    %c0_i32 = arith.constant 0 : i32
    %c0_i32_0 = arith.constant 0 : i32
    %c0_i32_1 = arith.constant 0 : i32
    return %c0_i32, %c0_i32_0 : i32, i32
  }
  func.func @transform_15(%arg0: i32) -> (i32, i32, i32) {
    %c0_i32 = arith.constant 0 : i32
    %c0_i32_0 = arith.constant 0 : i32
    %c0_i32_1 = arith.constant 0 : i32
    return %arg0, %c0_i32, %c0_i32_0 : i32, i32, i32
  }
}

</mosaic_0001>

<bundles_post_ra>
// kernel: tpu_custom_call.1
= control target key start
LH: loop header
LB: loop body
LE: loop exit
PB: predicated region body
PF: predicated region fallthrough
CT: control target
= control target key end

     0   :  { %20 = vsyncpa [#allocation3], 0  ;;  %s3607_s0 = inlined_call_operand.vmem [shape: f32[2,4,128], index: 0, kind: input, shape index: {}]   ;;  %s3608_s1 = inlined_call_operand.vmem [shape: f32[4,1], index: 1, kind: input, shape index: {}]   ;;  %s3609_s2 = inlined_call_operand.vmem [shape: f32[4,1], index: 2, kind: input, shape index: {}]   ;;  %s3610_s3 = inlined_call_operand.hbm [shape: f32[3,128,128], index: 3, kind: input, shape index: {}]   ;;  %s3611_s4 = inlined_call_operand.vmem [shape: f32[8,4], index: 4, kind: input, shape index: {}]   ;;  %s3612_s5 = inlined_call_operand.vmem [shape: f32[8,1], index: 5, kind: input, shape index: {}]   ;;  %s3613_s6 = inlined_call_operand.vmem [shape: f32[8,24], index: 6, kind: input, shape index: {}]   ;;  %s3614_s7 = inlined_call_operand.vmem [shape: f32[8,4], index: 7, kind: input, shape index: {}]   ;;  %s3615_s8 = inlined_call_operand.vmem [shape: f32[8,1], index: 8, kind: input, shape index: {}]   ;;  %s3616_s9 = inlined_call_operand.vmem [shape: f32[16,8], index: 9, kind: input, shape index: {}]   ;;  %s3617_s10 = inlined_call_operand.vmem [shape: f32[16,1], index: 10, kind: input, shape index: {}]   ;;  %s3618_s11 = inlined_call_operand.vmem [shape: f32[16,48], index: 11, kind: input, shape index: {}]   ;;  %s3619_s12 = inlined_call_operand.vmem [shape: f32[16,16], index: 12, kind: input, shape index: {}]   ;;  %s3620_s13 = inlined_call_operand.vmem [shape: f32[16,1], index: 13, kind: input, shape index: {}]   ;;  %s3621_s14 = inlined_call_operand.vmem [shape: f32[16,48], index: 14, kind: input, shape index: {}]   ;;  %s3622_s15 = inlined_call_operand.hbm [shape: f32[2,16,128], index: 15, kind: output, shape index: {}]  }
   0x1   :  { %21 = vsyncpa [#allocation4], 0 }
   0x2   :  { %23 = vsyncpa [#allocation4 + $0x1], 0  ;;  %s3176_s18 = smov 0   ;;  %s3178_s19 = smov 0  }
   0x3   :  { %s3180_s20 = smov 0   ;;  %s3182_s21 = smov 0  }
   0x4 LB: > { %3631 = sst [smem:[#allocation8_spill]] %s3072_s18  ;;  %s3197_s22 = sadd.s32 4294967295, %s3084_s21   ;;  %s3084_s21 = sphi %s3182_s21, %s3647_s21   ;;  %s3080_s20 = sphi %s3180_s20, %s3649_s20   ;;  %s3076_s19 = sphi %s3178_s19, %s3651_s19   ;;  %s3072_s18 = sphi %s3176_s18, %s3650_s18  }
   0x5   : > { %3632 = sst [smem:[#allocation9_spill]] %s3080_s20  ;;  %s2023_s23 = sadd.s32 4294967294, %s3084_s21  }
   0x6   : > { %s3201_s24 = sadd.s32 1, %s3084_s21   ;;  %s356_s25 = sadd.s32 1, %s3080_s20 }
   0x7   : > { %3633 = sst [smem:[#allocation10_spill]] %s3201_s24  ;;  %s353_s26 = ssub.s32 %s3084_s21, %s3201_s24 }
   0x8   : > { %p366_p0 = scmp.ne.s32.totalorder %s3080_s20, %s3076_s19  ;;  %p354_p1 = scmp.eq.s32.totalorder %s353_s26, 0 }
   0x9   : > { %p367_p2 = scmp.eq.s32.totalorder %s3197_s22, 1  ;;  %p372_p3 = scmp.ne.s32.totalorder %s3076_s19, %s3072_s18 }
   0xa   : > { %p373_p4 = scmp.eq.s32.totalorder %s2023_s23, 1  ;;  %p2024_p7 = scmp.ge.s32.totalorder %s3084_s21, 1 }
   0xb   : > { %s3212_s27 = scalar_select %p354_p1, %s3080_s20, %s356_s25  }
   0xc   : > { %p3214_p5 = por %p367_p2, %p366_p0  ;;  %p3218_p6 = por %p373_p4, %p372_p3 }
   0xd   : > { %3634 = sst [smem:[#allocation11_spill]] %s3212_s27  ;;  %p380_p8 = scmp.lt.s32.totalorder %s3084_s21, 3 }
   0xe   : > { %s3635_s28 = scalar_select %p3214_p5, 1, 0 }
   0xf   : > { %s3636_s29 = scalar_select %p3218_p6, 1, 0 }
  0x10   : > { %p3628_p9 = scmp.eq.s32.totalorder %s3197_s22, 0  ;;  %p3225_p10 = pnand %p2024_p7, %p380_p8 }
  0x11   : > { %3637 = sst [smem:[#allocation12_spill]] %s3636_s29  ;;  %s3086_s16 = smov [#allocation2]  }
  0x12   : > { %s3638_s30 = scalar_select %p3225_p10, 1, 0 }
  0x13   : > { %s398_s17 = sshll.u32 %s3086_s16, 4  ;;  %p2932_p11 = pneg %p3225_p10  ;;  %s399_s17 = int_to_ptr.vmem [resolvable:$true] %s398_s17 }
  0x14   : > { %s2990_s27 = scalar_lea.hbm %s3610_s3, 6144 }
  0x15   : > { %p3233_p12 = pnand %p3628_p9, %p2932_p11  ;;  %p2991_p13 = scmp.ne.s32.totalorder %s3610_s3, %s2990_s27 }
  0x16   : > { %p2997_p3 = scmp.lt.u32.totalorder %s2990_s27, %s3610_s3 }
  0x17   : > { %p2992_p0 = pneg %p3233_p12 }
  0x19   : > { %p2993_p1 = pnand %p2992_p0, %p2991_p13 }
  0x1b   : > { %p2994_p2 = pneg %p2993_p1 }
  0x1d   : > { %p2999_p4 = pnand %p2997_p3, %p2994_p2 }
  0x1f   : > { %3002 = shalt.err (!%p2999_p4)
}
  0x20   : > { %s3003_s18 = scalar_lea.vmem %s399_s17, 6144  ;;  %p3011_p9 = scmp.lt.s32.totalorder %s399_s17, %s399_s17 }
  0x21   : > { %p3004_p7 = scmp.ne.s32.totalorder %s399_s17, %s3003_s18  ;;  %p3012_p6 = scmp.lt.s32.totalorder %s3003_s18, %s3003_s18 }
  0x23   : > { %p3006_p8 = pnand %p3004_p7, %p2992_p0  ;;  %p3013_p5 = por %p3012_p6, %p3011_p9 }
  0x25   : > { %p3007_p11 = pneg %p3006_p8 }
  0x27   : > { %p3014_p10 = pnand %p3013_p5, %p3007_p11 }
  0x29   : > { %3017 = shalt.err (!%p3014_p10)
}
  0x2a   : > { %s3087_s20 = smov 128   ;;  %s3088_s24 = smov 8  }
  0x2b   : > { %2935 = dma.hbm_to_vmem [thread:$0]  (!%p3233_p12), %s3610_s3, 6144, %s399_s17, [#allocation3], %s3087_s20, %s3087_s20, %s3088_s24  }
  0x2c   : > { %p3640_p13 = scmp.ne.s32.totalorder %s3638_s30, 0 }
  0x2d   : > { %p3641_p1 = scmp.eq.s32.totalorder (!%p3640_p13), %s3197_s22, 0 }
  0x2e   : > { %454 = sbr.rel (%p3640_p13) target bundleno = 3027 (0xbd3), region = 80 }
  0x35   : > { %3063 = dma.done.wait (%p3641_p1), [#allocation3], 6144   ;;  %p3642_p0 = pmov %p3641_p1 }
  0x36   : > { %p501_p5 = scmp.lt.s32.totalorder %s3197_s22, 1  ;;  %vm506_vm0 = vcmask 1041408   ;;  %v3089_v19 = vmov 0   ;;  %v595_v38 = vld [vmem:[%s3608_s1] sm:$0xf]  ;;  %v1526_v40 = vld [vmem:[%s3620_s13 + $0x8] sm:$0xff] }
  0x37   : > { %3065 = vsyncadd (%p3642_p0), [#allocation3], 4294961152  ;;  %2984 = vset.pattern.permute.xlu0 %v3089_v19  ;;  %2985 = vset.pattern.permute.xlu1 %v3089_v19  ;;  %v602_v52 = vld [vmem:[%s3609_s2] sm:$0xf]  ;;  %v3090_v54 = vmov 0.0   ;;  %vm3091_vm1 = vmmov 0  }
  0x38   : > { %s502_s18 = scalar_select %p501_p5, %s3197_s22, 1  ;;  %v660_v53 = vld [vmem:[%s3612_s5] sm:$0xff]  ;;  %2240 = vmatprep.subr.mxu0 %v3090_v54  ;;  %2242 = vmatprep.mubr.msk.f32.mxu0 %vm3091_vm1, %v3090_v54  ;;  %v1115_v57 = vld [vmem:[%s3617_s10 + $0x8] sm:$0xff]  ;;  %v3092_v61 = vmov 0.0|0.0   ;;  %v611_v63 = vld [vmem:[#allocation2 + $0x10] sm:$0xff]  ;;  %vm670_vm2 = vcmask 1043456  }
  0x39   : > { %2277 = vmatprep.mubr.msk.f32.mxu1 %vm3091_vm1, %v3090_v54  ;;  %v956_v55 = vld [vmem:[%s3615_s8] sm:$0xff]  ;;  %v610_v60 = vld [vmem:[#allocation2 + $0x8] sm:$0xff]  ;;  %2616 = vmatprep.subr.bf16.mxu1 %v3092_v61  ;;  %v624_v19 = vld [vmem:[#allocation2 + $0x78] sm:$0xff]  ;;  %vm666_vm3 = vcmask 31744   ;;  %vm1035_vm4 = vcmask 195584   ;;  %vm1126_vm5 = vcmask 64512  }
  0x3a   : > { %s2030_s27 = sshll.u32 %s502_s18, 2  ;;  %v1114_v56 = vld [vmem:[%s3617_s10] sm:$0xff]  ;;  %vm1435_vm7 = vcmask 392192   ;;  %vm1537_vm8 = vcmask 130048   ;;  %p3643_p9 = scmp.ne.s32.totalorder %s3635_s28, 0 }
  0x3b   : > { %s504_s16 = scalar_lea.vmem %s3607_s0, %s2030_s27  ;;  %v1525_v58 = vld [vmem:[%s3620_s13] sm:$0xff] }
  0x3c   : > { %v3264_v0 = vld [vmem:[%s504_s16] sm:$0xf]  ;;  %s2049_s16 = sshll.u32 %s3197_s22, 8 }
  0x3d   : > { %v507_v1 = vsel %vm506_vm0, %v3264_v0, 0.0  ;;  %v542_v2 = vrot.slane %v3264_v0, 2  ;;  %v609_v59 = vld [vmem:[#allocation2] sm:$0xff] }
  0x3e   : > { %508 = vadd.xlane.f32.xlu0 %v507_v1  ;;  %v3309_v62 = vpack.c.bf16 %v610_v60, %v609_v59  ;;  %v612_v1 = vld [vmem:[#allocation2 + $0x18] sm:$0xff] }
  0x3f   : > { %v544_v3 = vsel %vm506_vm0, %v542_v2, 0.0  ;;  %v3312_v2 = vpack.c.bf16 %v612_v1, %v611_v63  ;;  %v645_v63 = vld [vmem:[#allocation2 + $0x110] sm:$0xff]  ;;  %v646_v1 = vld [vmem:[#allocation2 + $0x118] sm:$0xff] }
  0x40   : > { %545 = vadd.xlane.f32.xlu1 %v544_v3  ;;  %2618 = vmatpush3.bf16.msra.mxu1 %v3309_v62  ;;  %v613_v3 = vld [vmem:[#allocation2 + $0x20] sm:$0xff] }
  0x41   : > { %2619 = vmatprep.subr.bf16.mxu1 %v3092_v61 }
  0x44   : > { %2621 = vmatpush3.bf16.msra.mxu1 %v3312_v2 }
  0x45   : > { %2622 = vmatprep.subr.bf16.mxu1 %v3092_v61 }
  0xcb   : > { %v509_v4 = vpop.xlane.xlu0 %508 }
  0xcc   : > { %v510_v5 = vrot.slane %v509_v4, 4 }
  0xcd   : > { %v546_v23 = vpop.xlane.xlu1 %545 }
  0xce   : > { %v511_v6 = vadd.f32 %v510_v5, %v509_v4  ;;  %v547_v24 = vrot.slane %v546_v23, 4  ;;  %v614_v4 = vld [vmem:[#allocation2 + $0x28] sm:$0xff] }
  0xcf   : > { %v3316_v5 = vpack.c.bf16 %v614_v4, %v613_v3  ;;  %v3387_v3 = vpack.c.bf16 %v646_v1, %v645_v63  ;;  %v647_v4 = vld [vmem:[#allocation2 + $0x120] sm:$0xff] }
  0xd0   : > { %v512_v7 = vrot.slane %v511_v6, 2  ;;  %v548_v25 = vadd.f32 %v547_v24, %v546_v23  ;;  %v1523_v63 = vld [vmem:[%s3619_s12] sm:$0xff] }
  0xd1   : > { %2624 = vmatpush3.bf16.msra.mxu1 %v3316_v5 }
  0xd2   : > { %v513_v8 = vadd.f32 %v512_v7, %v511_v6  ;;  %v549_v26 = vrot.slane %v548_v25, 2  ;;  %v615_v6 = vld [vmem:[#allocation2 + $0x30] sm:$0xff]  ;;  %v616_v7 = vld [vmem:[#allocation2 + $0x38] sm:$0xff]  ;;  %2625 = vmatprep.subr.bf16.mxu1 %v3092_v61 }
  0xd4   : > { %v514_v9 = vrot.slane %v513_v8, 1  ;;  %v550_v28 = vadd.f32 %v549_v26, %v548_v25  ;;  %v626_v26 = vld [vmem:[#allocation2 + $0x80] sm:$0xff] }
  0xd6   : > { %v515_v10 = vadd.f32 %v514_v9, %v513_v8  ;;  %v551_v29 = vrot.slane %v550_v28, 1  ;;  %v3320_v8 = vpack.c.bf16 %v616_v7, %v615_v6  ;;  %v617_v9 = vld [vmem:[#allocation2 + $0x40] sm:$0xff]  ;;  %v648_v6 = vld [vmem:[#allocation2 + $0x128] sm:$0xff] }
  0xd7   : > { %v3393_v7 = vpack.c.bf16 %v648_v6, %v647_v4 }
  0xd8   : > { %2914 = vpush %v515_v10  ;;  %v552_v31 = vadd.f32 %v551_v29, %v550_v28  ;;  %v618_v10 = vld [vmem:[#allocation2 + $0x48] sm:$0xff]  ;;  %2627 = vmatpush3.bf16.msra.mxu1 %v3320_v8 }
  0xd9   : > { %2628 = vmatprep.subr.bf16.mxu1 %v3092_v61 }
 0x109   : > { %s2915_s30 = spop %2914 }
 0x10a   : > { %s519_s17 = smul.f32 0.00390625, %s2915_s30 }
 0x10c   : > { %v520_v11 = vstv %s519_s17 }
 0x10d   : > { %v521_v12 = vsub.f32 %v3264_v0, %v520_v11 }
 0x10f   : > { %v522_v13 = vmul.f32 %v521_v12, %v521_v12  ;;  %v619_v12 = vld [vmem:[#allocation2 + $0x50] sm:$0xff] }
 0x111   : > { %v523_v14 = vsel %vm506_vm0, %v522_v13, 0.0  ;;  %v620_v13 = vld [vmem:[#allocation2 + $0x58] sm:$0xff] }
 0x112   : > { %524 = vadd.xlane.f32.xlu0 %v523_v14  ;;  %v3328_v14 = vpack.c.bf16 %v620_v13, %v619_v12  ;;  %v651_v13 = vld [vmem:[#allocation2 + $0x140] sm:$0xff] }
 0x19f   : > { %v525_v15 = vpop.xlane.xlu0 %524 }
 0x1a0   : > { %v526_v16 = vrot.slane %v525_v15, 4 }
 0x1a2   : > { %v527_v17 = vadd.f32 %v526_v16, %v525_v15  ;;  %v621_v15 = vld [vmem:[#allocation2 + $0x60] sm:$0xff]  ;;  %v622_v16 = vld [vmem:[#allocation2 + $0x68] sm:$0xff] }
 0x1a4   : > { %v528_v18 = vrot.slane %v527_v17, 2 }
 0x1a6   : > { %v529_v20 = vadd.f32 %v528_v18, %v527_v17  ;;  %v3332_v17 = vpack.c.bf16 %v622_v16, %v621_v15  ;;  %v623_v18 = vld [vmem:[#allocation2 + $0x70] sm:$0xff]  ;;  %v652_v15 = vld [vmem:[#allocation2 + $0x148] sm:$0xff] }
 0x1a7   : > { %v3401_v16 = vpack.c.bf16 %v652_v15, %v651_v13 }
 0x1a8   : > { %v530_v21 = vrot.slane %v529_v20, 1 }
 0x1aa   : > { %v531_v22 = vadd.f32 %v530_v21, %v529_v20  ;;  %v3336_v20 = vpack.c.bf16 %v624_v19, %v623_v18  ;;  %v653_v18 = vld [vmem:[#allocation2 + $0x150] sm:$0xff]  ;;  %v654_v19 = vld [vmem:[#allocation2 + $0x158] sm:$0xff] }
 0x1ac   : > { %2916 = vpush %v531_v22 }
 0x1dd   : > { %s2917_s20 = spop %2916 }
 0x1de   : > { %s535_s24 = smul.f32 0.00390625, %s2917_s20 }
 0x1e0   : > { %s536_s25 = sadd.f32 1e-05, %s535_s24 }
 0x1e2   : > { %v537_v27 = vstv %s536_s25 }
 0x1e3   : > { %2986 = vrsqrt.f32 %v537_v27  ;;  %v627_v27 = vld [vmem:[#allocation2 + $0x88] sm:$0xff] }
 0x1ed   : > { %v2987_v30 = vpop.eup %2986 }
 0x1ee   : > { %2918 = vpush %v2987_v30 }
 0x1ef   : > { %2920 = vpush %v552_v31  ;;  %v659_v31 = vld [vmem:[%s3611_s4] sm:$0xff] }
 0x21f   : > { %s3272_s26 = spop %2918 }
 0x220   : > { %s2921_s18 = spop %2920  ;;  %v540_v49 = vstv %s3272_s26 }
 0x221   : > { %s556_s27 = smul.f32 0.00390625, %s2921_s18 }
 0x223   : > { %v557_v32 = vstv %s556_s27  ;;  %s498_s27 = sand.u32 1, %s3076_s19  }
 0x224   : > { %v558_v33 = vsub.f32 %v3264_v0, %v557_v32  ;;  %v581_v34 = vsel %vm506_vm0, %v520_v11, %v557_v32  ;;  %v3324_v11 = vpack.c.bf16 %v618_v10, %v617_v9  ;;  %v3347_v32 = vpack.c.bf16 %v627_v27, %v626_v26  ;;  %v649_v9 = vld [vmem:[#allocation2 + $0x130] sm:$0xff]  ;;  %v650_v10 = vld [vmem:[#allocation2 + $0x138] sm:$0xff]  ;;  %s2029_s29 = sshll.u32 %s498_s27, 4  ;;  %s3566_s22 = scalar_lea.sflag [#allocation4], %s498_s27 }
 0x225   : > { %585 = vperm.xlu0 %2984, %v581_v34   ;;  %v629_v34 = vld [vmem:[#allocation2 + $0x98] sm:$0xff]  ;;  %v3397_v12 = vpack.c.bf16 %v650_v10, %v649_v9  ;;  %s500_s23 = scalar_lea.vmem [#allocation5], %s2029_s29 }
 0x226   : > { %v559_v35 = vmul.f32 %v558_v33, %v558_v33  ;;  %2630 = vmatpush3.bf16.msra.mxu1 %v3324_v11  ;;  %v628_v33 = vld [vmem:[#allocation2 + $0x90] sm:$0xff]  ;;  %v658_v26 = vld [vmem:[#allocation2 + $0x178] sm:$0xff]  ;;  %s1949_s26 = sshll.u32 %s500_s23, 4  ;;  %s3559_s26 = int_to_ptr.vmem [resolvable:$true] %s1949_s26 }
 0x227   : > { %2631 = vmatprep.subr.bf16.mxu1 %v3092_v61 }
 0x228   : > { %v561_v36 = vrot.slane %v559_v35, 2  ;;  %v630_v35 = vld [vmem:[#allocation2 + $0xa0] sm:$0xff] }
 0x229   : > { %1534 = vperm.xlu0 %2984, %v1526_v40  }
 0x22a   : > { %v563_v37 = vsel %vm506_vm0, %v561_v36, 0.0  ;;  %2633 = vmatpush3.bf16.msra.mxu1 %v3328_v14  ;;  %v631_v36 = vld [vmem:[#allocation2 + $0xa8] sm:$0xff] }
 0x22b   : > { %564 = vadd.xlane.f32.xlu1 %v563_v37  ;;  %2634 = vmatprep.subr.bf16.mxu1 %v3092_v61  ;;  %v3360_v37 = vpack.c.bf16 %v631_v36, %v630_v35 }
 0x22e   : > { %2636 = vmatpush3.bf16.msra.mxu1 %v3332_v17 }
 0x22f   : > { %2637 = vmatprep.subr.bf16.mxu1 %v3092_v61 }
 0x232   : > { %2639 = vmatpush3.bf16.msra.mxu1 %v3336_v20 }
 0x233   : > { %2664 = vmatprep.subr.bf16.mxu1 %v3092_v61 }
 0x23c   : > { %598 = vperm.xlu1 %2985, %v595_v38   ;;  %v632_v38 = vld [vmem:[#allocation2 + $0xb0] sm:$0xff] }
 0x2a4   : > { %v586_v22 = vpop.permute.xlu0 %585 }
 0x2a5   : > { %v588_v23 = vsub.f32 %v3264_v0, %v586_v22  ;;  %v3354_v0 = vpack.c.bf16 %v629_v34, %v628_v33  ;;  %v655_v22 = vld [vmem:[#allocation2 + $0x160] sm:$0xff] }
 0x2b8   : > { %v565_v39 = vpop.xlane.xlu1 %564 }
 0x2b9   : > { %v566_v41 = vrot.slane %v565_v39, 4 }
 0x2bb   : > { %v567_v42 = vadd.f32 %v566_v41, %v565_v39  ;;  %v633_v39 = vld [vmem:[#allocation2 + $0xb8] sm:$0xff]  ;;  %v634_v41 = vld [vmem:[#allocation2 + $0xc0] sm:$0xff] }
 0x2bc   : > { %v599_v21 = vpop.permute.xlu1 %598  ;;  %v3364_v40 = vpack.c.bf16 %v633_v39, %v632_v38 }
 0x2bd   : > { %v568_v43 = vrot.slane %v567_v42, 2 }
 0x2bf   : > { %v569_v44 = vadd.f32 %v568_v43, %v567_v42  ;;  %v635_v42 = vld [vmem:[#allocation2 + $0xc8] sm:$0xff] }
 0x2c0   : > { %v3368_v43 = vpack.c.bf16 %v635_v42, %v634_v41 }
 0x2c1   : > { %v570_v45 = vrot.slane %v569_v44, 1 }
 0x2c3   : > { %v571_v46 = vadd.f32 %v570_v45, %v569_v44  ;;  %v636_v44 = vld [vmem:[#allocation2 + $0xd0] sm:$0xff]  ;;  %v637_v45 = vld [vmem:[#allocation2 + $0xd8] sm:$0xff] }
 0x2c5   : > { %2922 = vpush %v571_v46  ;;  %v3372_v46 = vpack.c.bf16 %v637_v45, %v636_v44 }
 0x2f6   : > { %s2923_s17 = spop %2922 }
 0x2f7   : > { %s575_s20 = smul.f32 0.00390625, %s2923_s17 }
 0x2f9   : > { %s576_s24 = sadd.f32 1e-05, %s575_s20  ;;  %s3564_s20 = scalar_lea.hbm %s3622_s15, %s2049_s16 }
 0x2fb   : > { %v577_v47 = vstv %s576_s24  ;;  %s3018_s24 = scalar_lea.vmem %s3559_s26, 256 }
 0x2fc   : > { %2988 = vrsqrt.f32 %v577_v47  ;;  %v638_v47 = vld [vmem:[#allocation2 + $0xe0] sm:$0xff]  ;;  %p3019_p6 = scmp.ne.s32.totalorder %s3559_s26, %s3018_s24 }
 0x2fe   : > { %p3020_p10 = pnand %p3019_p6, %p3643_p9 }
 0x300   : > { %p3021_p12 = pneg %p3020_p10 }
 0x306   : > { %v2989_v48 = vpop.eup %2988 }
 0x307   : > { %2924 = vpush %v2989_v48  ;;  %v639_v48 = vld [vmem:[#allocation2 + $0xe8] sm:$0xff] }
 0x338   : > { %s2925_s25 = spop %2924 }
 0x339   : > { %v580_v50 = vstv %s2925_s25  ;;  %s3093_s25 = smov [#allocation5]  }
 0x33a   : > { %v582_v51 = vsel %vm506_vm0, %v540_v49, %v580_v50  ;;  %v3376_v49 = vpack.c.bf16 %v639_v48, %v638_v47  ;;  %v640_v50 = vld [vmem:[#allocation2 + $0xf0] sm:$0xff]  ;;  %v1113_v47 = vld [vmem:[%s3616_s9 + $0x8] sm:$0xff]  ;;  %s3022_s18 = sshll.u32 %s3093_s25, 4  ;;  %s3023_s18 = int_to_ptr.vmem [resolvable:$false] %s3022_s18 }
 0x33b   : > { %591 = vperm.xlu1 %2985, %v582_v51   ;;  %v641_v51 = vld [vmem:[#allocation2 + $0xf8] sm:$0xff]  ;;  %s3024_s29 = scalar_lea.vmem %s3023_s18, 512  ;;  %p3025_p2 = scmp.lt.s32.totalorder %s3559_s26, %s3023_s18 }
 0x33c   : > { %p3026_p3 = scmp.lt.s32.totalorder %s3024_s29, %s3018_s24 }
 0x33e   : > { %p3027_p4 = por %p3026_p3, %p3025_p2 }
 0x33f   : > { %605 = vperm.xlu1 %2985, %v602_v52   ;;  %v3381_v52 = vpack.c.bf16 %v641_v51, %v640_v50 }
 0x340   : > { %p3028_p7 = pnand %p3027_p4, %p3021_p12 }
 0x343   : > { %663 = vperm.xlu1 %2985, %v660_v53   ;;  %v643_v53 = vld [vmem:[#allocation2 + $0x100] sm:$0xff] }
 0x347   : > { %959 = vperm.xlu1 %2985, %v956_v55   ;;  %v644_v55 = vld [vmem:[#allocation2 + $0x108] sm:$0xff] }
 0x34b   : > { %1118 = vperm.xlu1 %2985, %v1114_v56  }
 0x34f   : > { %1123 = vperm.xlu1 %2985, %v1115_v57  }
 0x353   : > { %1529 = vperm.xlu1 %2985, %v1525_v58   ;;  %v3384_v58 = vpack.c.bf16 %v644_v55, %v643_v53 }
 0x3ba   : > { %v592_v24 = vpop.permute.xlu1 %591 }
 0x3bb   : > { %v594_v25 = vmul.f32 %v592_v24, %v588_v23  ;;  %v656_v23 = vld [vmem:[#allocation2 + $0x168] sm:$0xff] }
 0x3bc   : > { %v3409_v24 = vpack.c.bf16 %v656_v23, %v655_v22  ;;  %v1845_v23 = vld [vmem:[%s3621_s14 + $0x8] sm:$0xff] }
 0x3bd   : > { %v601_v28 = vmul.f32 %v599_v21, %v594_v25  ;;  %v3405_v21 = vpack.c.bf16 %v654_v19, %v653_v18  ;;  %v657_v25 = vld [vmem:[#allocation2 + $0x170] sm:$0xff]  ;;  %v1524_v18 = vld [vmem:[%s3619_s12 + $0x8] sm:$0xff] }
 0x3be   : > { %v606_v29 = vpop.permute.xlu1 %605  ;;  %v3413_v27 = vpack.c.bf16 %v658_v26, %v657_v25 }
 0x3bf   : > { %v3342_v30 = vadd.f32 %v606_v29, %v601_v28  ;;  %v955_v28 = vld [vmem:[%s3614_s7] sm:$0xff] }
 0x3c1   : > { %2241 = vmatpush3.msk.msra.mxu0 %vm670_vm2, %v3342_v30 }
 0x3c2   : > { %2243 = vmatmul.mubr.msk.f32.vlgmr.msra.gmra.mrb[0].mxu0 %vm666_vm3, %v659_v31  ;;  %2640 = vmatprep.subr.bf16.mxu0 %v3092_v61  ;;  %v664_v56 = vpop.permute.xlu1 %663 }
 0x3c3   : > { %2642 = vmatpush3.bf16.msra.mxu0 %v3347_v32  ;;  %2312 = vmatprep.mubr.msk.f32.mxu0 %vm3091_vm1, %v3090_v54 }
 0x3c4   : > { %2643 = vmatprep.subr.bf16.mxu0 %v3092_v61 }
 0x3c6   : > { %v960_v38 = vpop.permute.xlu1 %959 }
 0x3c7   : > { %2645 = vmatpush3.bf16.msra.mxu0 %v3354_v0 }
 0x3c8   : > { %2646 = vmatprep.subr.bf16.mxu0 %v3092_v61 }
 0x3ca   : > { %v1119_v48 = vpop.permute.xlu1 %1118 }
 0x3cb   : > { %2648 = vmatpush3.bf16.msra.mxu0 %v3360_v37 }
 0x3cc   : > { %2649 = vmatprep.subr.bf16.mxu0 %v3092_v61 }
 0x3ce   : > { %v1124_v53 = vpop.permute.xlu1 %1123 }
 0x3cf   : > { %2651 = vmatpush3.bf16.msra.mxu0 %v3364_v40 }
 0x3d0   : > { %2652 = vmatprep.subr.bf16.mxu0 %v3092_v61 }
 0x3d3   : > { %2654 = vmatpush3.bf16.msra.mxu0 %v3368_v43 }
 0x3d4   : > { %2655 = vmatprep.subr.bf16.mxu0 %v3092_v61 }
 0x3d7   : > { %2657 = vmatpush3.bf16.msra.mxu0 %v3372_v46 }
 0x3d8   : > { %2658 = vmatprep.subr.bf16.mxu0 %v3092_v61 }
 0x3db   : > { %2660 = vmatpush3.bf16.msra.mxu0 %v3376_v49 }
 0x3dc   : > { %2661 = vmatprep.subr.bf16.mxu0 %v3092_v61 }
 0x3df   : > { %2663 = vmatpush3.bf16.msra.mxu0 %v3381_v52 }
 0x495   : > { %v740_v57 = vpop.f32.mrb[0].mxu0 }
 0x496   : > { %v741_v59 = vadd.f32 %v740_v57, %v664_v56  ;;  %v2244_v60 = vpop.f32.mrb[1].mxu0 }
 0x497   : > { %v1434_v60 = vld [vmem:[%s3618_s11 + $0x8] sm:$0xff] }
 0x498   : > { %2278 = vmatmul.mubr.f32.vlgmr.msra.gmra.mrb[0].mxu1 %v741_v59  ;;  %2313 = vmatmul.mubr.f32.vlgmr.msra.gmra.mrb[2].mxu0 %v741_v59 }
 0x499   : > { %2666 = vmatpush3.bf16.msra.mxu1 %v3384_v58  ;;  %2347 = vmatprep.mubr.msk.f32.mxu1 %vm3091_vm1, %v3090_v54 }
 0x49a   : > { %2667 = vmatprep.subr.bf16.mxu1 %v3092_v61 }
 0x49d   : > { %2669 = vmatpush3.bf16.msra.mxu1 %v3387_v3 }
 0x49e   : > { %2670 = vmatprep.subr.bf16.mxu1 %v3092_v61 }
 0x4a1   : > { %2672 = vmatpush3.bf16.msra.mxu1 %v3393_v7 }
 0x4a2   : > { %2673 = vmatprep.subr.bf16.mxu1 %v3092_v61 }
 0x4a5   : > { %2675 = vmatpush3.bf16.msra.mxu1 %v3397_v12 }
 0x4a6   : > { %2676 = vmatprep.subr.bf16.mxu1 %v3092_v61 }
 0x4a9   : > { %2678 = vmatpush3.bf16.msra.mxu1 %v3401_v16 }
 0x4aa   : > { %2679 = vmatprep.subr.bf16.mxu1 %v3092_v61 }
 0x4ad   : > { %2681 = vmatpush3.bf16.msra.mxu1 %v3405_v21 }
 0x4ae   : > { %2682 = vmatprep.subr.bf16.mxu1 %v3092_v61 }
 0x4b1   : > { %2684 = vmatpush3.bf16.msra.mxu1 %v3409_v24 }
 0x4b2   : > { %2685 = vmatprep.subr.bf16.mxu1 %v3092_v61 }
 0x4b5   : > { %2687 = vmatpush3.bf16.msra.mxu1 %v3413_v27 }
 0x4b6   : > { %2350 = vmatprep.subr.mxu1 %v3090_v54 }
 0x4b8   : > { %2348 = vmatmul.mubr.f32.vlgmr.msra.gmra.mrb[2].mxu1 %v741_v59 }
 0x4b9   : > { %2351 = vmatpush3.msk.msra.mxu1 %vm670_vm2, %v3342_v30  ;;  %2352 = vmatprep.mubr.msk.f32.mxu1 %vm3091_vm1, %v3090_v54 }
 0x4ba   : > { %2688 = vmatprep.subr.bf16.mxu1 %v3092_v61  ;;  %v954_v61 = vld [vmem:[%s3613_s6] sm:$0xff] }
 0x4bc   : > { %2353 = vmatmul.mubr.msk.f32.vlgmr.msra.gmra.mrb[4].mxu1 %vm666_vm3, %v955_v28 }
 0x4bd   : > { %2361 = vmatprep.mubr.msk.f32.mxu1 %vm3091_vm1, %v3090_v54 }
 0x56b   : > { %v810_v29 = vpop.f32.mrb[0].mxu1  ;;  %v880_v31 = vpop.f32.mrb[2].mxu0 }
 0x56c   : > { %v2689_v33 = vpack.c.bf16 %v880_v31, %v810_v29  ;;  %v2279_v34 = vpop.f32.mrb[1].mxu1  ;;  %v2314_v35 = vpop.f32.mrb[3].mxu0 }
 0x56e   : > { %2690 = vmatpush3.bf16.msra.mxu1 %v2689_v33 }
 0x56f   : > { %2359 = vmatprep.subr.mxu1 %v3090_v54  ;;  %v1112_v54 = vld [vmem:[%s3616_s9] sm:$0xff] }
 0x570   : > { %2366 = vmatprep.mubr.msk.f32.mxu0 %vm1126_vm5, %v1112_v54 }
 0x58b   : > { %v950_v30 = vpop.f32.mrb[2].mxu1 }
 0x58c   : > { %v2349_v36 = vpop.f32.mrb[3].mxu1  ;;  %2360 = vmatpush3.msra.mxu1 %v950_v30 }
 0x58d   : > { %2362 = vmatmul.mubr.msk.f32.vlgmr.msra.gmra.mrb[4].mxu1 %vm1035_vm4, %v954_v61  ;;  %2724 = vmatprep.subr.bf16.mxu1 %v3347_v32 }
 0x58e   : > { %2726 = vmatpush3.bf16.msra.mxu1 %v3347_v32 }
 0x58f   : > { %2728 = vmatprep.subr.bf16.mxu1 %v3354_v0 }
 0x592   : > { %2730 = vmatpush3.bf16.msra.mxu1 %v3354_v0 }
 0x593   : > { %2732 = vmatprep.subr.bf16.mxu1 %v3360_v37 }
 0x596   : > { %2734 = vmatpush3.bf16.msra.mxu1 %v3360_v37 }
 0x597   : > { %2736 = vmatprep.subr.bf16.mxu1 %v3364_v40 }
 0x59a   : > { %2738 = vmatpush3.bf16.msra.mxu1 %v3364_v40 }
 0x59b   : > { %2740 = vmatprep.subr.bf16.mxu1 %v3368_v43 }
 0x59e   : > { %2742 = vmatpush3.bf16.msra.mxu1 %v3368_v43 }
 0x59f   : > { %2744 = vmatprep.subr.bf16.mxu1 %v3372_v46 }
 0x5a2   : > { %2746 = vmatpush3.bf16.msra.mxu1 %v3372_v46 }
 0x5a3   : > { %2748 = vmatprep.subr.bf16.mxu1 %v3376_v49 }
 0x5a6   : > { %2750 = vmatpush3.bf16.msra.mxu1 %v3376_v49 }
 0x5a7   : > { %2752 = vmatprep.subr.bf16.mxu1 %v3381_v52 }
 0x5aa   : > { %2754 = vmatpush3.bf16.msra.mxu1 %v3381_v52 }
 0x660   : > { %v1105_v39 = vpop.f32.mrb[4].mxu1 }
 0x661   : > { %v2911_v41 = vadd.f32 %v1105_v39, %v960_v38  ;;  %v2363_v42 = vpop.f32.mrb[5].mxu1 }
 0x663   : > { %v1110_v44 = vmul.f32 0.05, %v2911_v41  ;;  %vm1109_vm6 = vcmp.ge.f32.partialorder %v2911_v41, 0.0 }
 0x665   : > { %v1111_v45 = vsel %vm1109_vm6, %v2911_v41, %v1110_v44 }
 0x666   : > { %2364 = vmatprep.subr.mxu0 %v1111_v45 }
 0x667   : > { %2365 = vmatpush3.msra.mxu0 %v1111_v45 }
 0x668   : > { %2367 = vmatmul.mubr.msk.f32.vlgmr.msra.gmra.mrb[4].mxu0 %vm1126_vm5, %v1113_v47  ;;  %2692 = vmatprep.subr.bf16.mxu0 %v3309_v62 }
 0x669   : > { %2694 = vmatpush3.bf16.msra.mxu0 %v3309_v62 }
 0x66a   : > { %2696 = vmatprep.subr.bf16.mxu0 %v3312_v2 }
 0x66d   : > { %2698 = vmatpush3.bf16.msra.mxu0 %v3312_v2 }
 0x66e   : > { %2700 = vmatprep.subr.bf16.mxu0 %v3316_v5 }
 0x671   : > { %2702 = vmatpush3.bf16.msra.mxu0 %v3316_v5 }
 0x672   : > { %2704 = vmatprep.subr.bf16.mxu0 %v3320_v8 }
 0x675   : > { %2706 = vmatpush3.bf16.msra.mxu0 %v3320_v8 }
 0x676   : > { %2708 = vmatprep.subr.bf16.mxu0 %v3324_v11 }
 0x679   : > { %2710 = vmatpush3.bf16.msra.mxu0 %v3324_v11 }
 0x67a   : > { %2712 = vmatprep.subr.bf16.mxu0 %v3328_v14 }
 0x67d   : > { %2714 = vmatpush3.bf16.msra.mxu0 %v3328_v14 }
 0x67e   : > { %2716 = vmatprep.subr.bf16.mxu0 %v3332_v17 }
 0x681   : > { %2718 = vmatpush3.bf16.msra.mxu0 %v3332_v17 }
 0x682   : > { %2720 = vmatprep.subr.bf16.mxu0 %v3336_v20 }
 0x685   : > { %2722 = vmatpush3.bf16.msra.mxu0 %v3336_v20 }
 0x686   : > { %2756 = vmatprep.subr.bf16.mxu0 %v3384_v58 }
 0x73b   : > { %v2368_v50 = vpop.f32.mrb[4].mxu0 }
 0x73c   : > { %v1199_v51 = vpop.f32.mrb[5].mxu0  ;;  %v1205_v56 = vadd.f32 %v2368_v50, %v1124_v53 }
 0x73d   : > { %v1200_v55 = vadd.f32 %v1199_v51, %v1119_v48 }
 0x73f   : > { %2401 = vmatprep.mubr.f32.mxu0 %v1200_v55  ;;  %2436 = vmatprep.mubr.f32.mxu1 %v1200_v55 }
 0x740   : > { %2402 = vmatmul.mubr.f32.vlgmr.msra.gmra.mrb[6].mxu0 %v1205_v56  ;;  %2437 = vmatmul.mubr.f32.vlgmr.msra.gmra.mrb[6].mxu1 %v1205_v56 }
 0x741   : > { %2758 = vmatpush3.bf16.msra.mxu0 %v3384_v58  ;;  %2471 = vmatprep.mubr.f32.mxu0 %v1200_v55 }
 0x742   : > { %2760 = vmatprep.subr.bf16.mxu0 %v3387_v3 }
 0x745   : > { %2762 = vmatpush3.bf16.msra.mxu0 %v3387_v3 }
 0x746   : > { %2764 = vmatprep.subr.bf16.mxu0 %v3393_v7 }
 0x749   : > { %2766 = vmatpush3.bf16.msra.mxu0 %v3393_v7 }
 0x74a   : > { %2768 = vmatprep.subr.bf16.mxu0 %v3397_v12 }
 0x74d   : > { %2770 = vmatpush3.bf16.msra.mxu0 %v3397_v12 }
 0x74e   : > { %2772 = vmatprep.subr.bf16.mxu0 %v3401_v16 }
 0x751   : > { %2774 = vmatpush3.bf16.msra.mxu0 %v3401_v16 }
 0x752   : > { %2776 = vmatprep.subr.bf16.mxu0 %v3405_v21 }
 0x755   : > { %2778 = vmatpush3.bf16.msra.mxu0 %v3405_v21 }
 0x756   : > { %2780 = vmatprep.subr.bf16.mxu0 %v3409_v24 }
 0x759   : > { %2782 = vmatpush3.bf16.msra.mxu0 %v3409_v24 }
 0x75a   : > { %2784 = vmatprep.subr.bf16.mxu0 %v3413_v27 }
 0x75d   : > { %2786 = vmatpush3.bf16.msra.mxu0 %v3413_v27 }
 0x75e   : > { %2804 = vmatprep.subr.bf16.mxu0 %v3309_v62 }
 0x760   : > { %2472 = vmatmul.mubr.f32.vlgmr.msra.gmra.mrb[8].mxu0 %v1205_v56 }
 0x761   : > { %2806 = vmatpush3.bf16.msra.mxu0 %v3309_v62  ;;  %v1433_v62 = vld [vmem:[%s3618_s11] sm:$0xff] }
 0x762   : > { %2808 = vmatprep.subr.bf16.mxu0 %v3312_v2  ;;  %2486 = vmatprep.mubr.msk.f32.mxu1 %vm1435_vm7, %v1433_v62 }
 0x765   : > { %2810 = vmatpush3.bf16.msra.mxu0 %v3312_v2 }
 0x766   : > { %2812 = vmatprep.subr.bf16.mxu0 %v3316_v5 }
 0x769   : > { %2814 = vmatpush3.bf16.msra.mxu0 %v3316_v5 }
 0x76a   : > { %2816 = vmatprep.subr.bf16.mxu0 %v3320_v8 }
 0x76d   : > { %2818 = vmatpush3.bf16.msra.mxu0 %v3320_v8 }
 0x76e   : > { %2820 = vmatprep.subr.bf16.mxu0 %v3324_v11 }
 0x771   : > { %2822 = vmatpush3.bf16.msra.mxu0 %v3324_v11 }
 0x772   : > { %2824 = vmatprep.subr.bf16.mxu0 %v3328_v14 }
 0x775   : > { %2826 = vmatpush3.bf16.msra.mxu0 %v3328_v14 }
 0x776   : > { %2828 = vmatprep.subr.bf16.mxu0 %v3332_v17 }
 0x779   : > { %2830 = vmatpush3.bf16.msra.mxu0 %v3332_v17 }
 0x77a   : > { %2832 = vmatprep.subr.bf16.mxu0 %v3336_v20 }
 0x77d   : > { %2834 = vmatpush3.bf16.msra.mxu0 %v3336_v20 }
 0x77e   : > { %2868 = vmatprep.subr.bf16.mxu0 %v3384_v58 }
 0x813   : > { %v2403_v2 = vpop.f32.mrb[6].mxu0  ;;  %v2438_v5 = vpop.f32.mrb[6].mxu1 }
 0x814   : > { %v1274_v8 = vpop.f32.mrb[7].mxu0  ;;  %v1349_v11 = vpop.f32.mrb[7].mxu1 }
 0x815   : > { %v2787_v14 = vpack.c.bf16 %v2403_v2, %v1274_v8  ;;  %v2791_v57 = vpack.c.bf16 %v2438_v5, %v1349_v11 }
 0x817   : > { %2788 = vmatprep.subr.bf16.mxu1 %v2787_v14 }
 0x818   : > { %2790 = vmatpush3.bf16.msra.mxu1 %v2787_v14 }
 0x819   : > { %2792 = vmatprep.subr.bf16.mxu1 %v2791_v57 }
 0x81c   : > { %2794 = vmatpush3.bf16.msra.mxu1 %v2791_v57 }
 0x833   : > { %v2473_v17 = vpop.f32.mrb[8].mxu0 }
 0x834   : > { %v1424_v20 = vpop.f32.mrb[9].mxu0 }
 0x835   : > { %v2795_v59 = vpack.c.bf16 %v2473_v17, %v1424_v20 }
 0x837   : > { %2796 = vmatprep.subr.bf16.mxu1 %v2795_v59 }
 0x838   : > { %2798 = vmatpush3.bf16.msra.mxu1 %v2795_v59 }
 0x83b   : > { %2487 = vmatmul.mubr.msk.f32.vlgmr.msra.gmra.mrb[8].mxu1 %vm1435_vm7, %v1434_v60 }
 0x83c   : > { %2493 = vmatprep.mubr.msk.f32.mxu1 %vm1537_vm8, %v1523_v63 }
 0x90e   : > { %v2488_v1 = vpop.f32.mrb[8].mxu1 }
 0x90f   : > { %vm1518_vm9 = vcmp.ge.f32.partialorder %v2488_v1, 0.0  ;;  %v1520_v4 = vmul.f32 0.05, %v2488_v1  ;;  %v1508_v6 = vpop.f32.mrb[9].mxu1 }
 0x910   : > { %vm1517_vm10 = vcmp.ge.f32.partialorder %v1508_v6, 0.0  ;;  %v1519_v9 = vmul.f32 0.05, %v1508_v6 }
 0x911   : > { %v1522_v10 = vsel %vm1518_vm9, %v2488_v1, %v1520_v4 }
 0x912   : > { %v1521_v13 = vsel %vm1517_vm10, %v1508_v6, %v1519_v9 }
 0x913   : > { %v2799_v15 = vpack.c.bf16 %v1522_v10, %v1521_v13 }
 0x915   : > { %2800 = vmatprep.subr.bf16.mxu1 %v2799_v15 }
 0x916   : > { %2802 = vmatpush3.bf16.msra.mxu1 %v2799_v15 }
 0x917   : > { %2836 = vmatprep.subr.bf16.mxu1 %v3347_v32 }
 0x919   : > { %2494 = vmatmul.mubr.msk.f32.vlgmr.msra.gmra.mrb[10].mxu1 %vm1537_vm8, %v1524_v18 }
 0x91a   : > { %2838 = vmatpush3.bf16.msra.mxu1 %v3347_v32 }
 0x91b   : > { %2840 = vmatprep.subr.bf16.mxu1 %v3354_v0 }
 0x91e   : > { %2842 = vmatpush3.bf16.msra.mxu1 %v3354_v0  ;;  %v1530_v0 = vpop.permute.xlu1 %1529 }
 0x91f   : > { %2844 = vmatprep.subr.bf16.mxu1 %v3360_v37 }
 0x922   : > { %2846 = vmatpush3.bf16.msra.mxu1 %v3360_v37 }
 0x923   : > { %2848 = vmatprep.subr.bf16.mxu1 %v3364_v40 }
 0x926   : > { %2850 = vmatpush3.bf16.msra.mxu1 %v3364_v40  ;;  %v1535_v40 = vpop.permute.xlu0 %1534 }
 0x927   : > { %2852 = vmatprep.subr.bf16.mxu1 %v3368_v43 }
 0x92a   : > { %2854 = vmatpush3.bf16.msra.mxu1 %v3368_v43  ;;  %v1844_v43 = vld [vmem:[%s3621_s14] sm:$0xff] }
 0x92b   : > { %2856 = vmatprep.subr.bf16.mxu1 %v3372_v46 }
 0x92e   : > { %2858 = vmatpush3.bf16.msra.mxu1 %v3372_v46 }
 0x92f   : > { %2860 = vmatprep.subr.bf16.mxu1 %v3376_v49 }
 0x932   : > { %2862 = vmatpush3.bf16.msra.mxu1 %v3376_v49 }
 0x933   : > { %2864 = vmatprep.subr.bf16.mxu1 %v3381_v52 }
 0x936   : > { %2866 = vmatpush3.bf16.msra.mxu1 %v3381_v52 }
 0x9ec   : > { %v2495_v32 = vpop.f32.mrb[10].mxu1 }
 0x9ed   : > { %v1610_v37 = vpop.f32.mrb[11].mxu1  ;;  %v1616_v22 = vadd.f32 %v2495_v32, %v1535_v40 }
 0x9ee   : > { %v1611_v19 = vadd.f32 %v1610_v37, %v1530_v0 }
 0x9f0   : > { %2528 = vmatprep.mubr.f32.mxu0 %v1611_v19  ;;  %2563 = vmatprep.mubr.f32.mxu1 %v1611_v19 }
 0x9f1   : > { %2529 = vmatmul.mubr.f32.vlgmr.msra.gmra.mrb[10].mxu0 %v1616_v22  ;;  %2564 = vmatmul.mubr.f32.vlgmr.msra.gmra.mrb[12].mxu1 %v1616_v22 }
 0x9f2   : > { %2870 = vmatpush3.bf16.msra.mxu0 %v3384_v58  ;;  %2598 = vmatprep.mubr.f32.mxu0 %v1611_v19 }
 0x9f3   : > { %2872 = vmatprep.subr.bf16.mxu0 %v3387_v3  ;;  %2613 = vmatprep.mubr.msk.f32.mxu1 %vm1435_vm7, %v1844_v43 }
 0x9f6   : > { %2874 = vmatpush3.bf16.msra.mxu0 %v3387_v3 }
 0x9f7   : > { %2876 = vmatprep.subr.bf16.mxu0 %v3393_v7 }
 0x9fa   : > { %2878 = vmatpush3.bf16.msra.mxu0 %v3393_v7 }
 0x9fb   : > { %2880 = vmatprep.subr.bf16.mxu0 %v3397_v12 }
 0x9fe   : > { %2882 = vmatpush3.bf16.msra.mxu0 %v3397_v12 }
 0x9ff   : > { %2884 = vmatprep.subr.bf16.mxu0 %v3401_v16 }
 0xa02   : > { %2886 = vmatpush3.bf16.msra.mxu0 %v3401_v16 }
 0xa03   : > { %2888 = vmatprep.subr.bf16.mxu0 %v3405_v21 }
 0xa06   : > { %2890 = vmatpush3.bf16.msra.mxu0 %v3405_v21 }
 0xa07   : > { %2892 = vmatprep.subr.bf16.mxu0 %v3409_v24 }
 0xa0a   : > { %2894 = vmatpush3.bf16.msra.mxu0 %v3409_v24 }
 0xa0b   : > { %2896 = vmatprep.subr.bf16.mxu0 %v3413_v27 }
 0xa0e   : > { %2898 = vmatpush3.bf16.msra.mxu0 %v3413_v27 }
 0xa11   : > { %2599 = vmatmul.mubr.f32.vlgmr.msra.gmra.mrb[12].mxu0 %v1616_v22 }
 0xac4   : > { %v2530_v46 = vpop.f32.mrb[10].mxu0  ;;  %v2565_v49 = vpop.f32.mrb[12].mxu1 }
 0xac5   : > { %v1685_v52 = vpop.f32.mrb[11].mxu0  ;;  %v1760_v58 = vpop.f32.mrb[13].mxu1 }
 0xac6   : > { %v2899_v3 = vpack.c.bf16 %v2530_v46, %v1685_v52  ;;  %v2903_v7 = vpack.c.bf16 %v2565_v49, %v1760_v58 }
 0xac8   : > { %2900 = vmatprep.subr.bf16.mxu1 %v2899_v3 }
 0xac9   : > { %2902 = vmatpush3.bf16.msra.mxu1 %v2899_v3 }
 0xaca   : > { %2904 = vmatprep.subr.bf16.mxu1 %v2903_v7 }
 0xacd   : > { %2906 = vmatpush3.bf16.msra.mxu1 %v2903_v7 }
 0xae4   : > { %v2600_v12 = vpop.f32.mrb[12].mxu0 }
 0xae5   : > { %v1835_v16 = vpop.f32.mrb[13].mxu0 }
 0xae6   : > { %v2907_v21 = vpack.c.bf16 %v2600_v12, %v1835_v16 }
 0xae8   : > { %2908 = vmatprep.subr.bf16.mxu1 %v2907_v21 }
 0xae9   : > { %2910 = vmatpush3.bf16.msra.mxu1 %v2907_v21 }
 0xaec   : > { %2614 = vmatmul.mubr.msk.f32.vlgmr.msra.gmra.mrb[14].mxu1 %vm1435_vm7, %v1845_v23 }
 0xbbf   : > { %v2615_v24 = vpop.f32.mrb[14].mxu1 }
 0xbc0   : > { %vm1928_vm11 = vcmp.ge.f32.partialorder %v2615_v24, 0.0  ;;  %v1930_v25 = vmul.f32 0.05, %v2615_v24  ;;  %v1918_v26 = vpop.f32.mrb[15].mxu1 }
 0xbc1   : > { %vm1927_vm12 = vcmp.ge.f32.partialorder %v1918_v26, 0.0  ;;  %v1929_v27 = vmul.f32 0.05, %v1918_v26 }
 0xbc2   : > { %v1932_v28 = vsel %vm1928_vm11, %v2615_v24, %v1930_v25 }
 0xbc3   : > { %1934 = vst [vmem:[%s500_s23 + $0x8] sm:$0xff] %v1932_v28  ;;  %v1931_v29 = vsel %vm1927_vm12, %v1918_v26, %v1929_v27 }
 0xbc4   : > { %1933 = vst [vmem:[%s500_s23] sm:$0xff] %v1931_v29 }
 0xbc5   : > { %3031 = shalt.err (!%p3028_p7)
}
 0xbc6   : > { %s3032_s27 = scalar_lea.hbm %s3564_s20, 256  ;;  %s3036_s30 = scalar_lea.hbm %s3622_s15, 512 }
 0xbc7   : > { %p3033_p8 = scmp.ne.s32.totalorder %s3564_s20, %s3032_s27  ;;  %p3037_p1 = scmp.lt.u32.totalorder %s3564_s20, %s3622_s15 }
 0xbc8   : > { %p3038_p0 = scmp.lt.u32.totalorder %s3036_s30, %s3032_s27  ;;  %p3040_p6 = scmp.lt.u32.totalorder %s3032_s27, %s3564_s20 }
 0xbc9   : > { %p3034_p11 = pnand %p3033_p8, %p3643_p9 }
 0xbca   : > { %p3039_p5 = por %p3038_p0, %p3037_p1 }
 0xbcb   : > { %p3035_p13 = pneg %p3034_p11 }
 0xbcc   : > { %p3041_p10 = por %p3040_p6, %p3039_p5 }
 0xbce   : > { %p3042_p12 = pnand %p3041_p10, %p3035_p13 }
 0xbd0   : > { %3045 = shalt.err (!%p3042_p12)
}
 0xbd1   : > { %s3094_s24 = smov 128   ;;  %s3095_s18 = smov 8  }
 0xbd2   : > { %2930 = dma.vmem_to_hbm [thread:$0]  (%p3643_p9), %s3559_s26, 256, %s3564_s20, %s3566_s22, %s3094_s24, %s3094_s24, %s3095_s18  }
 0xbd3 PF: > { %s3644_s29 = sld [smem:[#allocation8_spill]]  ;;  %s3645_s23 = sld [smem:[#allocation12_spill]] }
 0xbd4   : > { %p2942_p2 = scmp.ge.s32.totalorder %s3084_s21, 2 }
 0xbd9   : > { %s1964_s16 = sand.u32 1, %s3644_s29   ;;  %p3646_p3 = scmp.ne.s32.totalorder %s3645_s23, 0 }
 0xbda   : > { %s1965_s27 = scalar_lea.sflag [#allocation4], %s1964_s16 }
 0xbdb   : > { %p2937_p4 = pnand %p2942_p2, %p3646_p3 }
 0xbdd   : > { %3067 = dma.done.wait (!%p2937_p4), %s1965_s27, 256  }
 0xbde   : > { %3069 = vsyncadd (!%p2937_p4), %s1965_s27, 4294967040  ;;  %s3647_s21 = sld [smem:[#allocation10_spill]]  ;;  %s3648_s30 = sld [smem:[#allocation9_spill]] }
 0xbdf   : > { %s3649_s20 = sld [smem:[#allocation11_spill]]  ;;  %s3650_s18 = smov %s3076_s19 }
 0xbe4   : > { %p26_p7 = scmp.ge.s32.totalorder %s3647_s21, 4   ;;  %s3651_s19 = smov %s3648_s30 }
 0xbe6   :  { %28 = sbr.rel (!%p26_p7) target bundleno = 4 (0x4), region = 122 }
 0xbed   :  { %1970 = vsyncpa [#allocation3], 1 }
 0xbee   :  { %1972 = vsyncpa [#allocation3 + $0x1], 1 }
 0xbef   :  { %1973 = vsyncpa [#allocation4], 1 }
 0xbf0   :  { %1975 = vsyncpa [#allocation4 + $0x1], 1 }

</bundles_post_ra>
